<compile_context>
chip_gen: v5e
topology: v5e:2x2
jax: 0.10.0
libtpu: 0.0.40
codegen_flags: <defaults>
</compile_context>

<pallas_src>
import jax
import jax.numpy as jnp
from jax import lax
from jax.experimental import pallas as pl
from jax.experimental.pallas import tpu as pltpu

LN_EPS = 1e-5


# ---------------------------------------------------------------------------
# Tiling / VMEM helpers
# ---------------------------------------------------------------------------
def _round_up(x, m):
    return ((x + m - 1) // m) * m


def _choose_block_rows(rows, hidden, itemsize, *, target_tile_bytes=4 << 20,
                       row_quantum=8, max_rows=4096):
    """Row-tile size giving ~target_tile_bytes per streamed operand tile.

    dtype-aware (itemsize), quantized to `row_quantum` (8 for pure VPU work,
    256 for MXU-fed tiles: native M granularity on v6e/v7x and a multiple of
    v5e's 128), and never larger than the 8-rounded row count.
    """
    br = target_tile_bytes // max(1, hidden * itemsize)
    br = max(row_quantum, min(max_rows, br))
    br = (br // row_quantum) * row_quantum
    return max(8, min(br, _round_up(rows, 8)))


def _choose_block_k(hidden):
    """Contraction-dim slab for the fused matmul; must divide H exactly so the
    padded region of a ragged K slab can never contaminate the accumulator."""
    if hidden <= 512 or hidden % 128 != 0:
        return hidden
    for tk in (512, 384, 256, 128):
        if hidden % tk == 0:
            return tk
    return hidden


def _vmem_limit_bytes(tile_bytes_list, scratch_bytes=0):
    """Scoped-VMEM budget: double-buffered streamed tiles + scratch + headroom.

    Never clamps below the actual requirement; upper bound derived from the
    chip's physical VMEM when queryable (v5e/v6e 128 MiB, v7x 64 MiB).
    """
    need = sum(2 * int(b) for b in tile_bytes_list) + int(scratch_bytes) + (2 << 20)
    cap = 64 << 20
    try:
        cap = int(pltpu.get_tpu_info().vmem_capacity_bytes)
    except Exception:
        pass
    hi = max(int(cap * 0.9), need)          # never below the requirement
    return int(min(max(need, 32 << 20), hi))


# ---------------------------------------------------------------------------
# Kernels
# ---------------------------------------------------------------------------
def _layernorm_rows(h_f32, w, b, out_dtype):
    """Row-wise LayerNorm of an f32 tile; matches nn.LayerNorm (biased var, eps=1e-5).

    One-pass statistics: sum(h) and sum(h*h) are independent reductions that
    pipeline through the XLU; var = E[h^2] - mean^2 (clamped at 0 vs rounding).
    """
    mean = jnp.mean(h_f32, axis=-1, keepdims=True)
    mean_sq = jnp.mean(h_f32 * h_f32, axis=-1, keepdims=True)
    var = jnp.maximum(mean_sq - mean * mean, 0.0)
    return ((h_f32 - mean) * lax.rsqrt(var + LN_EPS) * w + b).astype(out_dtype)


def _residual_ln_kernel(a_ref, x_ref, sub_ref, w_ref, b_ref, o_ref):
    # a_ref:   SMEM (1,)      residual scale `a`
    # x_ref:   VMEM (BR, H)   residual input tile
    # sub_ref: VMEM (BR, H)   sublayer(x) tile (precomputed externally)
    # w_ref:   VMEM (1, H)    LayerNorm weight (f32)
    # b_ref:   VMEM (1, H)    LayerNorm bias   (f32)
    a = a_ref[0]
    h = x_ref[...].astype(jnp.float32) + a * sub_ref[...].astype(jnp.float32)
    o_ref[...] = _layernorm_rows(h, w_ref[...], b_ref[...], o_ref.dtype)


def _fused_linear_residual_ln_kernel(a_ref, xk_ref, xres_ref, wk_ref, bsub_ref,
                                     w_ref, b_ref, o_ref, acc_ref):
    # Sublayer = dense projection fused on the MXU, K-tiled over the hidden dim.
    # xk_ref:   VMEM (BR, tk)  LHS chunk for this K step
    # xres_ref: VMEM (BR, H)   full residual row tile (index constant in k ->
    #                          DMA'd once per row tile, not per K step)
    # wk_ref:   VMEM (tk, H)   bf16 weight slab
    # acc_ref:  VMEM (BR, H)   f32 accumulator scratch
    k = pl.program_id(1)

    @pl.when(k == 0)
    def _():
        acc_ref[...] = jnp.zeros_like(acc_ref)

    acc_ref[...] += jnp.dot(xk_ref[...].astype(jnp.bfloat16), wk_ref[...],
                            preferred_element_type=jnp.float32)

    @pl.when(k == pl.num_programs(1) - 1)
    def _():
        a = a_ref[0]
        sub = acc_ref[...] + bsub_ref[...]
        h = xres_ref[...].astype(jnp.float32) + a * sub
        o_ref[...] = _layernorm_rows(h, w_ref[...], b_ref[...], o_ref.dtype)


# ---------------------------------------------------------------------------
# Wrappers
# ---------------------------------------------------------------------------
def sublayer_connection(x, sub_out, ln_weight, ln_bias, a, *, block_rows=None):
    """General SublayerConnection: LayerNorm(x + a * sub_out). x, sub_out: (B,S,H)."""
    B, S, H = x.shape
    rows = B * S
    isz = jnp.dtype(x.dtype).itemsize
    if block_rows is None:
        block_rows = _choose_block_rows(rows, H, isz)

    x2 = x.reshape(rows, H)
    s2 = sub_out.reshape(rows, H)
    w2 = ln_weight.reshape(1, H).astype(jnp.float32)
    b2 = ln_bias.reshape(1, H).astype(jnp.float32)
    a1 = jnp.asarray(a, jnp.float32).reshape(1)

    tile = block_rows * H * isz
    vmem = _vmem_limit_bytes([tile, tile, tile, 4 * H, 4 * H])

    # Ragged last block handled by Pallas masking: LN is row-wise, garbage rows
    # in the padded region stay in their own rows and their writes are dropped.
    out = pl.pallas_call(
        _residual_ln_kernel,
        out_shape=jax.ShapeDtypeStruct((rows, H), x.dtype),
        grid_spec=pltpu.PrefetchScalarGridSpec(
            num_scalar_prefetch=0,
            grid=(pl.cdiv(rows, block_rows),),
            in_specs=[
                pl.BlockSpec(memory_space=pltpu.SMEM),             # a (scalar)
                pl.BlockSpec((block_rows, H), lambda i: (i, 0)),   # x
                pl.BlockSpec((block_rows, H), lambda i: (i, 0)),   # sublayer(x)
                pl.BlockSpec((1, H), lambda i: (0, 0)),            # LN weight
                pl.BlockSpec((1, H), lambda i: (0, 0)),            # LN bias
            ],
            out_specs=pl.BlockSpec((block_rows, H), lambda i: (i, 0)),
            # NOTE: raise activation specs to pipeline_mode=pl.Buffered(3) only
            # if xprof shows exposed DMA at grid-step boundaries.
        ),
        compiler_params=pltpu.CompilerParams(
            dimension_semantics=("parallel",),
            vmem_limit_bytes=vmem,
        ),
    )(a1, x2, s2, w2, b2)
    return out.reshape(B, S, H)


def sublayer_connection_fused_linear(x, w_sub, b_sub, ln_weight, ln_bias, a,
                                     *, block_rows=None, block_k=None):
    """Fused variant for a dense sublayer: LayerNorm(x + a * (x @ w_sub + b_sub)).

    The (H,H) weight is streamed as (block_k, H) bf16 slabs (K-tiled matmul with
    an f32 VMEM accumulator), so VMEM stays bounded for large H on every chip
    generation; residual + LayerNorm run in the last-K epilogue.
    """
    B, S, H = x.shape
    rows = B * S
    isz = jnp.dtype(x.dtype).itemsize
    if block_k is None:
        block_k = _choose_block_k(H)
    assert H % block_k == 0, "block_k must divide the hidden size exactly"
    nk = H // block_k
    if block_rows is None:
        # MXU-fed tile: quantize M to 256 (v6e/v7x native, multiple of v5e's 128).
        block_rows = _choose_block_rows(rows, H, isz,
                                        target_tile_bytes=2 << 20,
                                        row_quantum=256)

    x2 = x.reshape(rows, H)
    wsub = w_sub.astype(jnp.bfloat16)                    # streamed as (block_k, H) slabs
    bsub = b_sub.reshape(1, H).astype(jnp.float32)
    w2 = ln_weight.reshape(1, H).astype(jnp.float32)
    b2 = ln_bias.reshape(1, H).astype(jnp.float32)
    a1 = jnp.asarray(a, jnp.float32).reshape(1)

    vmem = _vmem_limit_bytes(
        [block_rows * block_k * isz,          # x LHS chunk
         block_rows * H * isz,                # x residual tile (constant in k)
         block_k * H * 2,                     # bf16 weight slab
         block_rows * H * isz,                # output tile
         4 * H, 4 * H, 4 * H],                # bsub, LN weight, LN bias
        scratch_bytes=block_rows * H * 4)     # f32 accumulator

    out = pl.pallas_call(
        _fused_linear_residual_ln_kernel,
        out_shape=jax.ShapeDtypeStruct((rows, H), x.dtype),
        grid_spec=pltpu.PrefetchScalarGridSpec(
            num_scalar_prefetch=0,
            grid=(pl.cdiv(rows, block_rows), nk),
            in_specs=[
                pl.BlockSpec(memory_space=pltpu.SMEM),                     # a
                pl.BlockSpec((block_rows, block_k), lambda i, k: (i, k)),  # x (LHS)
                pl.BlockSpec((block_rows, H), lambda i, k: (i, 0)),        # x (residual)
                pl.BlockSpec((block_k, H), lambda i, k: (k, 0)),           # weight slab
                pl.BlockSpec((1, H), lambda i, k: (0, 0)),                 # sublayer bias
                pl.BlockSpec((1, H), lambda i, k: (0, 0)),                 # LN weight
                pl.BlockSpec((1, H), lambda i, k: (0, 0)),                 # LN bias
            ],
            out_specs=pl.BlockSpec((block_rows, H), lambda i, k: (i, 0)),
            scratch_shapes=[pltpu.VMEM((block_rows, H), jnp.float32)],
        ),
        compiler_params=pltpu.CompilerParams(
            dimension_semantics=("parallel", "arbitrary"),
            vmem_limit_bytes=vmem,
        ),
    )(a1, x2, x2, wsub, bsub, w2, b2)
    return out.reshape(B, S, H)


# ---------------------------------------------------------------------------
# Pure-JAX references (two-pass variance, as nn.LayerNorm)
# ---------------------------------------------------------------------------
def reference(x, sub_out, ln_weight, ln_bias, a):
    h = x.astype(jnp.float32) + a * sub_out.astype(jnp.float32)
    mean = jnp.mean(h, axis=-1, keepdims=True)
    var = jnp.mean((h - mean) ** 2, axis=-1, keepdims=True)
    out = (h - mean) / jnp.sqrt(var + LN_EPS) * ln_weight + ln_bias
    return out.astype(x.dtype)


def reference_fused(x, w_sub, b_sub, ln_weight, ln_bias, a):
    sub = jnp.einsum("bsh,hk->bsk",
                     x.astype(jnp.bfloat16), w_sub.astype(jnp.bfloat16),
                     preferred_element_type=jnp.float32) + b_sub
    return reference(x, sub, ln_weight, ln_bias, a)


# ---------------------------------------------------------------------------
# Demo / self-test
# ---------------------------------------------------------------------------
if __name__ == "__main__":
    key = jax.random.PRNGKey(0)
    kx, kw, kb, ky, kz = jax.random.split(key, 5)

    H = 128  # max_d_model; production DynamicBERT hidden sizes are multiples of 128
    ln_w = jnp.ones((H,), jnp.float32)        # nn.LayerNorm default init
    ln_b = jnp.zeros((H,), jnp.float32)
    a_init = 1e-8                             # nn.Parameter(torch.tensor(1e-08))
    a_trained = 0.37                          # exercise a non-trivial residual scale

    # Model the external sublayer as a deterministic dense projection.
    w_sub = jax.random.normal(kw, (H, H), jnp.float32) / jnp.sqrt(H)
    b_sub = jax.random.normal(kb, (H,), jnp.float32) * 0.01

    # --- 1) general kernel (sublayer output precomputed), B=2, S=8, f32 ---
    B, S = 2, 8
    x = jax.random.normal(kx, (B, S, H), jnp.float32)
    sub_out = jnp.einsum("bsh,hk->bsk", x, w_sub) + b_sub
    out = jax.block_until_ready(
        sublayer_connection(x, sub_out, ln_w, ln_b, a_init))
    assert out.shape == (B, S, H)
    assert jnp.allclose(out, reference(x, sub_out, ln_w, ln_b, a_init),
                        atol=2e-5, rtol=2e-5)

    # --- 2) ragged row count (14 rows): masked partial last block, no pad/slice ---
    x2 = jax.random.normal(ky, (2, 7, H), jnp.float32)
    sub2 = jnp.einsum("bsh,hk->bsk", x2, w_sub) + b_sub
    out2 = jax.block_until_ready(
        sublayer_connection(x2, sub2, ln_w, ln_b, a_trained))
    assert jnp.allclose(out2, reference(x2, sub2, ln_w, ln_b, a_trained),
                        atol=2e-5, rtol=2e-5)

    # --- 3) bf16 activations through HBM (dtype-aware tiling; f32 LN stats) ---
    xb = x.astype(jnp.bfloat16)
    sb = sub_out.astype(jnp.bfloat16)
    outb = jax.block_until_ready(
        sublayer_connection(xb, sb, ln_w, ln_b, a_trained))
    refb = reference(xb, sb, ln_w, ln_b, a_trained)
    assert outb.dtype == jnp.bfloat16
    assert jnp.allclose(outb.astype(jnp.float32), refb.astype(jnp.float32),
                        atol=2e-2, rtol=2e-2)

    # --- 4) fused linear-sublayer variant, single weight slab (H=128) ---
    outf = jax.block_until_ready(
        sublayer_connection_fused_linear(x, w_sub, b_sub, ln_w, ln_b, a_trained))
    reff = reference_fused(x, w_sub, b_sub, ln_w, ln_b, a_trained)
    assert jnp.allclose(outf, reff, atol=1e-4, rtol=1e-4)

    # --- 5) fused variant with K-tiled weight (H=256, block_k=128 -> 2 K steps) ---
    H2 = 256
    kw2, kb2, kx2 = jax.random.split(kz, 3)
    ln_w2 = jnp.ones((H2,), jnp.float32)
    ln_b2 = jnp.zeros((H2,), jnp.float32)
    w_sub2 = jax.random.normal(kw2, (H2, H2), jnp.float32) / jnp.sqrt(H2)
    b_sub2 = jax.random.normal(kb2, (H2,), jnp.float32) * 0.01
    x3 = jax.random.normal(kx2, (2, 8, H2), jnp.float32)
    outk = jax.block_until_ready(
        sublayer_connection_fused_linear(x3, w_sub2, b_sub2, ln_w2, ln_b2,
                                         a_trained, block_k=128))
    refk = reference_fused(x3, w_sub2, b_sub2, ln_w2, ln_b2, a_trained)
    assert jnp.allclose(outk, refk, atol=1e-4, rtol=1e-4)

    print("KERNEL_OK")
</pallas_src>

<mosaic_0001>
module attributes {stable_mosaic.version = 11 : i64} {
  func.func @_residual_ln_kernel(%arg0: i32, %arg1: memref<1xf32, #tpu.memory_space<smem>>, %arg2: memref<16x128xf32, #tpu.memory_space<vmem>>, %arg3: memref<16x128xf32, #tpu.memory_space<vmem>>, %arg4: memref<1x128xf32, #tpu.memory_space<vmem>>, %arg5: memref<1x128xf32, #tpu.memory_space<vmem>>, %arg6: memref<16x128xf32, #tpu.memory_space<vmem>>) attributes {dimension_semantics = [#tpu.dimension_semantics<parallel>], iteration_bounds = array<i64: 1>, scalar_prefetch = 0 : i64, scratch_operands = 0 : i64, tpu.core_type = #tpu.core_type<tc>, window_params = [{transform_indices = @transform_0, window_bounds = array<i64: 1>}, {transform_indices = @transform_1, window_bounds = array<i64: 16, 128>}, {transform_indices = @transform_2, window_bounds = array<i64: 16, 128>}, {pipeline_mode = #tpu.pipeline_mode<synchronous>, transform_indices = @transform_3, window_bounds = array<i64: 1, 128>}, {pipeline_mode = #tpu.pipeline_mode<synchronous>, transform_indices = @transform_4, window_bounds = array<i64: 1, 128>}, {transform_indices = @transform_5, window_bounds = array<i64: 16, 128>}]} {
    %c0 = arith.constant 0 : index
    %0 = memref.load %arg1[%c0] : memref<1xf32, #tpu.memory_space<smem>>
    %c0_0 = arith.constant 0 : index
    %c0_1 = arith.constant 0 : index
    %1 = vector.load %arg2[%c0_0, %c0_1] : memref<16x128xf32, #tpu.memory_space<vmem>>, vector<16x128xf32>
    %c0_2 = arith.constant 0 : index
    %c0_3 = arith.constant 0 : index
    %2 = vector.load %arg3[%c0_2, %c0_3] : memref<16x128xf32, #tpu.memory_space<vmem>>, vector<16x128xf32>
    %3 = vector.broadcast %0 : f32 to vector<16x128xf32>
    %4 = arith.mulf %3, %2 : vector<16x128xf32>
    %5 = arith.addf %1, %4 : vector<16x128xf32>
    %c0_4 = arith.constant 0 : index
    %c0_5 = arith.constant 0 : index
    %6 = vector.load %arg4[%c0_4, %c0_5] : memref<1x128xf32, #tpu.memory_space<vmem>>, vector<1x128xf32>
    %c0_6 = arith.constant 0 : index
    %c0_7 = arith.constant 0 : index
    %7 = vector.load %arg5[%c0_6, %c0_7] : memref<1x128xf32, #tpu.memory_space<vmem>>, vector<1x128xf32>
    %cst = arith.constant dense<0.000000e+00> : vector<16xf32>
    %8 = vector.multi_reduction <add>, %5, %cst [1] : vector<16x128xf32> to vector<16xf32>
    %9 = vector.shape_cast %8 : vector<16xf32> to vector<16x1xf32>
    %cst_8 = arith.constant 1.280000e+02 : f32
    %10 = vector.broadcast %cst_8 : f32 to vector<16x1xf32>
    %11 = arith.divf %9, %10 : vector<16x1xf32>
    %12 = arith.mulf %5, %5 : vector<16x128xf32>
    %cst_9 = arith.constant dense<0.000000e+00> : vector<16xf32>
    %13 = vector.multi_reduction <add>, %12, %cst_9 [1] : vector<16x128xf32> to vector<16xf32>
    %14 = vector.shape_cast %13 : vector<16xf32> to vector<16x1xf32>
    %cst_10 = arith.constant 1.280000e+02 : f32
    %15 = vector.broadcast %cst_10 : f32 to vector<16x1xf32>
    %16 = arith.divf %14, %15 : vector<16x1xf32>
    %17 = arith.mulf %11, %11 : vector<16x1xf32>
    %18 = arith.subf %16, %17 : vector<16x1xf32>
    %cst_11 = arith.constant 0.000000e+00 : f32
    %19 = vector.broadcast %cst_11 : f32 to vector<16x1xf32>
    %20 = arith.maximumf %18, %19 : vector<16x1xf32>
    %21 = vector.broadcast %11 : vector<16x1xf32> to vector<16x128xf32>
    %22 = arith.subf %5, %21 : vector<16x128xf32>
    %cst_12 = arith.constant 9.99999974E-6 : f32
    %23 = vector.broadcast %cst_12 : f32 to vector<16x1xf32>
    %24 = arith.addf %20, %23 : vector<16x1xf32>
    %25 = math.rsqrt %24 : vector<16x1xf32>
    %26 = vector.broadcast %25 : vector<16x1xf32> to vector<16x128xf32>
    %27 = arith.mulf %22, %26 : vector<16x128xf32>
    %28 = vector.broadcast %6 : vector<1x128xf32> to vector<16x128xf32>
    %29 = arith.mulf %27, %28 : vector<16x128xf32>
    %30 = vector.broadcast %7 : vector<1x128xf32> to vector<16x128xf32>
    %31 = arith.addf %29, %30 : vector<16x128xf32>
    %c0_13 = arith.constant 0 : index
    %c0_14 = arith.constant 0 : index
    %32 = vector.load %arg6[%c0_13, %c0_14] : memref<16x128xf32, #tpu.memory_space<vmem>>, vector<16x128xf32>
    tpu.vector_store %arg6[%c0_13, %c0_14], %31 {strides = array<i32>} : memref<16x128xf32, #tpu.memory_space<vmem>>, vector<16x128xf32>,
    return
  }
  func.func @transform_0(%arg0: i32) -> i32 {
    %c0_i32 = arith.constant 0 : i32
    %c0_i32_0 = arith.constant 0 : i32
    return %c0_i32 : i32
  }
  func.func @transform_1(%arg0: i32) -> (i32, i32) {
    %c0_i32 = arith.constant 0 : i32
    %c0_i32_0 = arith.constant 0 : i32
    return %arg0, %c0_i32 : i32, i32
  }
  func.func @transform_2(%arg0: i32) -> (i32, i32) {
    %c0_i32 = arith.constant 0 : i32
    %c0_i32_0 = arith.constant 0 : i32
    return %arg0, %c0_i32 : i32, i32
  }
  func.func @transform_3(%arg0: i32) -> (i32, i32) {
    %c0_i32 = arith.constant 0 : i32
    %c0_i32_0 = arith.constant 0 : i32
    %c0_i32_1 = arith.constant 0 : i32
    return %c0_i32, %c0_i32_0 : i32, i32
  }
  func.func @transform_4(%arg0: i32) -> (i32, i32) {
    %c0_i32 = arith.constant 0 : i32
    %c0_i32_0 = arith.constant 0 : i32
    %c0_i32_1 = arith.constant 0 : i32
    return %c0_i32, %c0_i32_0 : i32, i32
  }
  func.func @transform_5(%arg0: i32) -> (i32, i32) {
    %c0_i32 = arith.constant 0 : i32
    %c0_i32_0 = arith.constant 0 : i32
    return %arg0, %c0_i32 : i32, i32
  }
}

</mosaic_0001>

<bundles_post_ra>
// kernel: tpu_custom_call.1
= control target key start
LH: loop header
LB: loop body
LE: loop exit
PB: predicated region body
PF: predicated region fallthrough
CT: control target
= control target key end

     0   :  { %11 = vsyncpa [#allocation4], 0  ;;  %s306_s0 = inlined_call_operand.<no memory space> [shape: f32[1], index: 0, kind: input, shape index: {}]   ;;  %s307_s1 = inlined_call_operand.hbm [shape: f32[16,128], index: 1, kind: input, shape index: {}]   ;;  %s308_s2 = inlined_call_operand.hbm [shape: f32[16,128], index: 2, kind: input, shape index: {}]   ;;  %s309_s3 = inlined_call_operand.vmem [shape: f32[1,128], index: 3, kind: input, shape index: {}]   ;;  %s310_s4 = inlined_call_operand.vmem [shape: f32[1,128], index: 4, kind: input, shape index: {}]   ;;  %s311_s5 = inlined_call_operand.hbm [shape: f32[16,128], index: 5, kind: output, shape index: {}]  }
   0x1   :  { %12 = vsyncpa [#allocation7], 0 }
   0x2   :  { %13 = vsyncpa [#allocation5], 0  ;;  %s20_s20 = sshll.u32 %s307_s1, 4  ;;  %s243_s21 = smov [#allocation3]   ;;  %s21_s20 = int_to_ptr.hbm [resolvable:$true] %s20_s20 }
   0x3   :  { %s22_s22 = sshll.u32 %s243_s21, 4  ;;  %s33_s25 = sshll.u32 %s308_s2, 4  ;;  %s23_s22 = int_to_ptr.vmem [resolvable:$true] %s22_s22  ;;  %s34_s25 = int_to_ptr.hbm [resolvable:$true] %s33_s25 }
   0x4   :  { %s244_s26 = smov 128   ;;  %s245_s27 = smov 8  }
   0x5   :  { %28 = dma.hbm_to_vmem [thread:$0]  %s21_s20, 256, %s23_s22, [#allocation4], %s244_s26, %s244_s26, %s245_s27  }
   0x6   :  { %s246_s28 = smov [#allocation6]  }
   0x7   :  { %s35_s29 = sshll.u32 %s246_s28, 4  ;;  %s36_s29 = int_to_ptr.vmem [resolvable:$true] %s35_s29 }
   0x8   :  { %41 = dma.hbm_to_vmem [thread:$0]  %s34_s25, 256, %s36_s29, [#allocation7], %s244_s26, %s244_s26, %s245_s27  }
   0x9   :  { %237 = dma.done.wait [#allocation4], 256  }
   0xa   :  { %238 = vsyncadd [#allocation4], 4294967040 }
   0xb   :  { %239 = dma.done.wait [#allocation7], 256  }
   0xc   :  { %240 = vsyncadd [#allocation7], 4294967040  ;;  %v59_v0 = vstv %s306_s0  ;;  %v55_v1 = vld [vmem:[#allocation3] sm:$0xff]  ;;  %v57_v2 = vld [vmem:[#allocation6] sm:$0xff]  ;;  %v247_v11 = vmov 128.0   ;;  %s137_s11 = sshll.u32 %s311_s5, 4  ;;  %s138_s11 = int_to_ptr.hbm [resolvable:$true] %s137_s11 }
   0xd   :  { %v60_v3 = vmul.f32 %v59_v0, %v57_v2  ;;  %v58_v4 = vld [vmem:[#allocation6 + $0x8] sm:$0xff]  ;;  %v56_v7 = vld [vmem:[#allocation3 + $0x8] sm:$0xff]  ;;  %159 = vrcp.f32 %v247_v11  ;;  %v157_v43 = vld [vmem:[%s309_s3] ss:$0 sm:$0xff]  ;;  %s248_s3 = smov [#allocation8]  }
   0xe   :  { %v61_v6 = vmul.f32 %v59_v0, %v58_v4  ;;  %v158_v47 = vld [vmem:[%s310_s4] ss:$0 sm:$0xff]  ;;  %s135_s8 = sshll.u32 %s248_s3, 4  ;;  %s136_s8 = int_to_ptr.vmem [resolvable:$true] %s135_s8 }
   0xf   :  { %v62_v5 = vadd.f32 %v60_v3, %v55_v1 }
  0x10   :  { %v63_v9 = vadd.f32 %v61_v6, %v56_v7 }
  0x11   :  { %66 = vadd.xlane.f32.xlu0 %v62_v5  ;;  %v79_v8 = vmul.f32 %v62_v5, %v62_v5 }
  0x12   :  { %v80_v10 = vmul.f32 %v63_v9, %v63_v9 }
  0x13   :  { %81 = vadd.xlane.f32.xlu1 %v79_v8  ;;  %v160_v12 = vpop.eup %159 }
  0x14   :  { %v71_v13 = vmul.f32 128.0, %v160_v12  ;;  %vm75_vm0 = vweird.f32 %v160_v12 }
  0x16   :  { %v72_v14 = vsub.f32 1.0, %v71_v13 }
  0x18   :  { %v73_v15 = vmul.f32 %v160_v12, %v72_v14 }
  0x19   :  { %68 = vadd.xlane.f32.xlu0 %v63_v9 }
  0x1a   :  { %v74_v16 = vadd.f32 %v160_v12, %v73_v15 }
  0x1b   :  { %83 = vadd.xlane.f32.xlu1 %v80_v10 }
  0x1c   :  { %v76_v17 = vsel %vm75_vm0, %v160_v12, %v74_v16 }
  0x84   :  { %v67_v18 = vpop.xlane.xlu0 %66 }
  0x85   :  { %v77_v19 = vmul.f32 %v76_v17, %v67_v18 }
  0x86   :  { %v82_v20 = vpop.xlane.xlu1 %81 }
  0x87   :  { %v87_v21 = vmul.f32 %v77_v19, %v77_v19  ;;  %v85_v22 = vmul.f32 %v82_v20, %v76_v17  ;;  %v93_v41 = vsub.f32 %v62_v5, %v77_v19 }
  0x89   :  { %v89_v23 = vsub.f32 %v85_v22, %v87_v21 }
  0x8b   :  { %v91_v24 = vmax.f32 %v89_v23, 0.0 }
  0x8c   :  { %v69_v25 = vpop.xlane.xlu0 %68 }
  0x8d   :  { %v95_v26 = vadd.f32 1e-05, %v91_v24  ;;  %v78_v27 = vmul.f32 %v76_v17, %v69_v25 }
  0x8e   :  { %v84_v28 = vpop.xlane.xlu1 %83 }
  0x8f   :  { %161 = vrsqrt.f32 %v95_v26  ;;  %v88_v29 = vmul.f32 %v78_v27, %v78_v27  ;;  %v86_v30 = vmul.f32 %v84_v28, %v76_v17  ;;  %vm103_vm2 = vweird.f32 %v95_v26 }
  0x90   :  { %v94_v53 = vsub.f32 %v63_v9, %v78_v27 }
  0x91   :  { %v90_v31 = vsub.f32 %v86_v30, %v88_v29 }
  0x93   :  { %v92_v32 = vmax.f32 %v90_v31, 0.0 }
  0x95   :  { %v162_v33 = vpop.eup %161  ;;  %v96_v35 = vadd.f32 1e-05, %v92_v32 }
  0x96   :  { %v98_v34 = vmul.f32 %v162_v33, %v95_v26  ;;  %vm104_vm1 = vweird.f32 %v162_v33 }
  0x97   :  { %163 = vrsqrt.f32 %v96_v35  ;;  %vm105_vm3 = vmor %vm103_vm2, %vm104_vm1  ;;  %vm113_vm5 = vweird.f32 %v96_v35 }
  0x98   :  { %v99_v36 = vmul.f32 %v162_v33, %v98_v34 }
  0x9a   :  { %v100_v37 = vmul.f32 0.5, %v99_v36 }
  0x9c   :  { %v101_v38 = vsub.f32 1.5, %v100_v37 }
  0x9d   :  { %v164_v39 = vpop.eup %163 }
  0x9e   :  { %v102_v40 = vmul.f32 %v162_v33, %v101_v38  ;;  %v108_v42 = vmul.f32 %v164_v39, %v96_v35  ;;  %vm114_vm4 = vweird.f32 %v164_v39 }
  0x9f   :  { %vm115_vm6 = vmor %vm113_vm5, %vm114_vm4 }
  0xa0   :  { %v106_v44 = vsel %vm105_vm3, %v162_v33, %v102_v40  ;;  %v109_v45 = vmul.f32 %v164_v39, %v108_v42 }
  0xa1   :  { %v117_v46 = vmul.f32 %v106_v44, %v93_v41 }
  0xa2   :  { %v110_v48 = vmul.f32 0.5, %v109_v45 }
  0xa3   :  { %v122_v49 = vmul.f32 %v157_v43, %v117_v46 }
  0xa4   :  { %v111_v50 = vsub.f32 1.5, %v110_v48 }
  0xa5   :  { %v127_v51 = vadd.f32 %v158_v47, %v122_v49 }
  0xa6   :  { %v112_v52 = vmul.f32 %v164_v39, %v111_v50 }
  0xa7   :  { %129 = vst [vmem:[#allocation8] sm:$0xff] %v127_v51 }
  0xa8   :  { %v116_v54 = vsel %vm115_vm6, %v164_v39, %v112_v52 }
  0xa9   :  { %v118_v55 = vmul.f32 %v116_v54, %v94_v53 }
  0xab   :  { %v123_v56 = vmul.f32 %v157_v43, %v118_v55 }
  0xad   :  { %v128_v57 = vadd.f32 %v158_v47, %v123_v56 }
  0xaf   :  { %130 = vst [vmem:[#allocation8 + $0x8] sm:$0xff] %v128_v57 }
  0xb0   :  { %143 = dma.vmem_to_hbm [thread:$0]  %s136_s8, 256, %s138_s11, [#allocation5], %s244_s26, %s244_s26, %s245_s27  }
  0xb1   :  { %241 = dma.done.wait [#allocation5], 256  }
  0xb2   :  { %242 = vsyncadd [#allocation5], 4294967040 }
  0xb3   :  { %148 = vsyncpa [#allocation4], 1 }
  0xb4   :  { %149 = vsyncpa [#allocation7], 1 }
  0xb5   :  { %150 = vsyncpa [#allocation5], 1 }

</bundles_post_ra>
